<compile_context>
chip_gen: v7x
topology: tpu7x:2x2x1
jax: 0.10.0
libtpu: 0.0.40
codegen_flags: <defaults>
</compile_context>

<pallas_src>
import jax
import jax.numpy as jnp
from jax.experimental import pallas as pl
from jax.experimental.pallas import tpu as pltpu


def _value_rbf_kernel(xt_ref, cneg2_ref, csq_ref, wt_ref, b_ref, out_ref):
    """One batch tile (batch on lanes) of ValueRBF: exp(-||x-c||^2) @ W + b.

    xt_ref:    [F, tb]  x^T tile (features on sublanes, batch on lanes)
    cneg2_ref: [R, F]   -2 * centers                   (VMEM-resident)
    csq_ref:   [R, 1]   ||c||^2 per center, column     (VMEM-resident)
    wt_ref:    [O, R]   Linear weight, transposed      (VMEM-resident)
    b_ref:     [O, 1]   Linear bias, column            (VMEM-resident)
    out_ref:   [O, tb]  output^T tile (lane-dense, unpadded)
    """
    xt = xt_ref[...]                                              # [F, tb]
    x_sq = jnp.sum(xt * xt, axis=0, keepdims=True)                # [1, tb] sublane reduce
    cross = jnp.dot(cneg2_ref[...], xt,
                    preferred_element_type=jnp.float32)           # [R, tb] = -2 c.x (MXU)
    # squared Euclidean distance, clamped at 0 (cdist distances are >= 0)
    d2 = jnp.maximum(x_sq + csq_ref[...] + cross, 0.0)            # [R, tb]
    rbf = jnp.exp(-d2)                                            # EUP
    out = jnp.dot(wt_ref[...], rbf,
                  preferred_element_type=jnp.float32)             # [O, tb] (MXU)
    out_ref[...] = (out + b_ref[...]).astype(out_ref.dtype)


def _reference_jax(x, params):
    """Pure-JAX path (direct-difference cdist), used for tiny batches."""
    diff = x[:, None, :] - params["centers"][None, :, :]
    d2 = jnp.sum(diff * diff, axis=-1)                # cdist(x, c) ** 2
    rbf = jnp.exp(-d2)
    return rbf @ params["w"] + params["b"]


def value_rbf_forward(x, params, *, block_b=2048, min_pallas_batch=1024):
    """Fused ValueRBF forward.

    x:       [B, num_inputs] float32
    params:  dict with
               centers [num_rbf_features, num_inputs]
               w       [num_rbf_features, num_outputs]   (Linear weight, [in,out])
               b       [1, num_outputs]
    returns: [B, num_outputs] float32
    """
    B, F = x.shape
    centers = params["centers"]
    w = params["w"]
    b = params["b"]
    R = centers.shape[0]
    num_outputs = w.shape[1]

    # Tiny batches: the fixed pallas_call launch + per-step overhead dominates;
    # let XLA's fused elementwise+matmul handle it.
    if B < min_pallas_batch:
        return _reference_jax(x, params)

    # ---- one-time, data-independent precompute (kept out of the kernel) ----
    cneg2 = (-2.0 * centers).astype(jnp.float32)              # [R, F]
    c_sq = jnp.sum(centers * centers, axis=1, keepdims=True)  # [R, 1]
    wt = w.T.astype(jnp.float32)                              # [O, R]
    b_col = b.reshape(num_outputs, 1).astype(jnp.float32)     # [O, 1]

    # ---- batch-on-lanes tiling: tile is a multiple of 128 lanes ----
    b_lanes = ((B + 127) // 128) * 128
    tb = min(block_b, b_lanes)
    # keep >= 2 grid steps when the batch allows, so the "parallel" axis can
    # shard across both TensorCores on v7x
    if b_lanes >= 256 and b_lanes // tb < 2:
        half = pl.cdiv(b_lanes, 2)
        tb = max(128, ((half + 127) // 128) * 128)
    b_full = pl.cdiv(b_lanes, tb) * tb
    grid = (b_full // tb,)

    # x^T [F, b_full]: features on sublanes, batch on lanes (lane-dense DMA)
    xt = x.T.astype(jnp.float32)
    if b_full != B:
        xt = jnp.pad(xt, ((0, 0), (0, b_full - B)))

    out_t = pl.pallas_call(
        _value_rbf_kernel,
        out_shape=jax.ShapeDtypeStruct((num_outputs, b_full), jnp.float32),
        grid=grid,
        in_specs=[
            pl.BlockSpec((F, tb), lambda i: (0, i)),            # x^T: tiled over batch
            pl.BlockSpec((R, F), lambda i: (0, 0)),             # -2*centers: resident
            pl.BlockSpec((R, 1), lambda i: (0, 0)),             # ||c||^2:    resident
            pl.BlockSpec((num_outputs, R), lambda i: (0, 0)),   # W^T:        resident
            pl.BlockSpec((num_outputs, 1), lambda i: (0, 0)),   # b:          resident
        ],
        out_specs=pl.BlockSpec((num_outputs, tb), lambda i: (0, i)),
        compiler_params=pltpu.CompilerParams(
            dimension_semantics=("parallel",)),
    )(xt, cneg2, c_sq, wt, b_col)

    return out_t[:, :B].T                                       # [B, num_outputs]


def init_params(key, num_inputs, num_rbf_features, num_outputs):
    """Mimics the PyTorch module: centers ~ randn, Linear default init
    (uniform(-1/sqrt(fan_in), 1/sqrt(fan_in)))."""
    # TODO(synk): the torch module keeps centers in float64 (.double()); the TPU
    # kernel uses float32 (no practical f64 path on the MXU/VPU).
    k_c, k_w, k_b = jax.random.split(key, 3)
    centers = jax.random.normal(k_c, (num_rbf_features, num_inputs), jnp.float32)
    bound = 1.0 / (num_rbf_features ** 0.5)
    w = jax.random.uniform(k_w, (num_rbf_features, num_outputs), jnp.float32,
                           -bound, bound)
    b = jax.random.uniform(k_b, (1, num_outputs), jnp.float32, -bound, bound)
    return {"centers": centers, "w": w, "b": b}


def reference_forward(x, params):
    """Pure-JAX reference matching the PyTorch forward semantics."""
    return _reference_jax(x, params)


if __name__ == "__main__":
    # Small shapes consistent with the module: batch=2, num_inputs=8,
    # num_rbf_features=32, num_outputs=1 (a value head).
    B, num_inputs, num_rbf, num_outputs = 2, 8, 32, 1

    key = jax.random.PRNGKey(0)
    pkey, xkey, xkey2 = jax.random.split(key, 3)
    params = init_params(pkey, num_inputs, num_rbf, num_outputs)

    # --- tiny batch, Pallas path forced (single grid step) ---
    x = jax.random.normal(xkey, (B, num_inputs), jnp.float32)
    out = value_rbf_forward(x, params, min_pallas_batch=0)
    jax.block_until_ready(out)
    out_ref = reference_forward(x, params)
    assert out.shape == (B, num_outputs)
    assert jnp.allclose(out, out_ref, atol=1e-4), "value mismatch vs reference (small B)"

    # --- larger, non-tile-aligned batch: multi-step parallel grid path ---
    B2 = 300
    x2 = jax.random.normal(xkey2, (B2, num_inputs), jnp.float32)
    out2 = value_rbf_forward(x2, params, block_b=128, min_pallas_batch=0)
    jax.block_until_ready(out2)
    out2_ref = reference_forward(x2, params)
    assert out2.shape == (B2, num_outputs)
    assert jnp.allclose(out2, out2_ref, atol=1e-4), "value mismatch vs reference (large B)"

    # --- tiny-batch XLA dispatch path (default threshold) still correct ---
    out3 = value_rbf_forward(x, params)
    jax.block_until_ready(out3)
    assert jnp.allclose(out3, out_ref, atol=1e-5)

    print("KERNEL_OK")
</pallas_src>

<mosaic_0001>
module attributes {stable_mosaic.version = 11 : i64} {
  func.func @_value_rbf_kernel(%arg0: i32, %arg1: memref<8x128xf32, #tpu.memory_space<vmem>>, %arg2: memref<32x8xf32, #tpu.memory_space<vmem>>, %arg3: memref<32x1xf32, #tpu.memory_space<vmem>>, %arg4: memref<1x32xf32, #tpu.memory_space<vmem>>, %arg5: memref<1x1xf32, #tpu.memory_space<vmem>>, %arg6: memref<1x128xf32, #tpu.memory_space<vmem>>) attributes {dimension_semantics = [#tpu.dimension_semantics<parallel>], iteration_bounds = array<i64: 1>, scalar_prefetch = 0 : i64, scratch_operands = 0 : i64, tpu.core_type = #tpu.core_type<tc>, window_params = [{transform_indices = @transform_0, window_bounds = array<i64: 8, 128>}, {pipeline_mode = #tpu.pipeline_mode<synchronous>, transform_indices = @transform_1, window_bounds = array<i64: 32, 8>}, {pipeline_mode = #tpu.pipeline_mode<synchronous>, transform_indices = @transform_2, window_bounds = array<i64: 32, 1>}, {pipeline_mode = #tpu.pipeline_mode<synchronous>, transform_indices = @transform_3, window_bounds = array<i64: 1, 32>}, {pipeline_mode = #tpu.pipeline_mode<synchronous>, transform_indices = @transform_4, window_bounds = array<i64: 1, 1>}, {transform_indices = @transform_5, window_bounds = array<i64: 1, 128>}]} {
    %c0 = arith.constant 0 : index
    %c0_0 = arith.constant 0 : index
    %0 = vector.load %arg1[%c0, %c0_0] : memref<8x128xf32, #tpu.memory_space<vmem>>, vector<8x128xf32>
    %1 = arith.mulf %0, %0 : vector<8x128xf32>
    %cst = arith.constant dense<0.000000e+00> : vector<128xf32>
    %2 = vector.multi_reduction <add>, %1, %cst [0] : vector<8x128xf32> to vector<128xf32>
    %3 = vector.shape_cast %2 : vector<128xf32> to vector<1x128xf32>
    %c0_1 = arith.constant 0 : index
    %c0_2 = arith.constant 0 : index
    %4 = vector.load %arg2[%c0_1, %c0_2] : memref<32x8xf32, #tpu.memory_space<vmem>>, vector<32x8xf32>
    %cst_3 = arith.constant dense<0.000000e+00> : vector<32x128xf32>
    %5 = tpu.matmul %4, %0, %cst_3 {dimension_numbers = #tpu.dot_dimension_numbers<[1], [0], [0], [1], [0, 0, 1, 1], [], []>} : vector<32x8xf32>, vector<8x128xf32>, vector<32x128xf32> -> vector<32x128xf32>
    %c0_4 = arith.constant 0 : index
    %c0_5 = arith.constant 0 : index
    %6 = vector.load %arg3[%c0_4, %c0_5] : memref<32x1xf32, #tpu.memory_space<vmem>>, vector<32x1xf32>
    %7 = vector.broadcast %3 : vector<1x128xf32> to vector<32x128xf32>
    %8 = vector.broadcast %6 : vector<32x1xf32> to vector<32x128xf32>
    %9 = arith.addf %7, %8 : vector<32x128xf32>
    %10 = arith.addf %9, %5 : vector<32x128xf32>
    %cst_6 = arith.constant 0.000000e+00 : f32
    %11 = vector.broadcast %cst_6 : f32 to vector<32x128xf32>
    %12 = arith.maximumf %10, %11 : vector<32x128xf32>
    %cst_7 = arith.constant 0.000000e+00 : f32
    %13 = vector.broadcast %cst_7 : f32 to vector<32x128xf32>
    %14 = arith.subf %13, %12 : vector<32x128xf32>
    %15 = math.exp %14 : vector<32x128xf32>
    %c0_8 = arith.constant 0 : index
    %c0_9 = arith.constant 0 : index
    %16 = vector.load %arg4[%c0_8, %c0_9] : memref<1x32xf32, #tpu.memory_space<vmem>>, vector<1x32xf32>
    %cst_10 = arith.constant dense<0.000000e+00> : vector<1x128xf32>
    %17 = tpu.matmul %16, %15, %cst_10 {dimension_numbers = #tpu.dot_dimension_numbers<[1], [0], [0], [1], [0, 0, 1, 1], [], []>} : vector<1x32xf32>, vector<32x128xf32>, vector<1x128xf32> -> vector<1x128xf32>
    %c0_11 = arith.constant 0 : index
    %c0_12 = arith.constant 0 : index
    %18 = vector.load %arg5[%c0_11, %c0_12] : memref<1x1xf32, #tpu.memory_space<vmem>>, vector<1x1xf32>
    %19 = vector.broadcast %18 : vector<1x1xf32> to vector<1x128xf32>
    %20 = arith.addf %17, %19 : vector<1x128xf32>
    %c0_13 = arith.constant 0 : index
    %c0_14 = arith.constant 0 : index
    %21 = vector.load %arg6[%c0_13, %c0_14] : memref<1x128xf32, #tpu.memory_space<vmem>>, vector<1x128xf32>
    tpu.vector_store %arg6[%c0_13, %c0_14], %20 {strides = array<i32>} : memref<1x128xf32, #tpu.memory_space<vmem>>, vector<1x128xf32>,
    return
  }
  func.func @transform_0(%arg0: i32) -> (i32, i32) {
    %c0_i32 = arith.constant 0 : i32
    %c0_i32_0 = arith.constant 0 : i32
    return %c0_i32, %arg0 : i32, i32
  }
  func.func @transform_1(%arg0: i32) -> (i32, i32) {
    %c0_i32 = arith.constant 0 : i32
    %c0_i32_0 = arith.constant 0 : i32
    %c0_i32_1 = arith.constant 0 : i32
    return %c0_i32, %c0_i32_0 : i32, i32
  }
  func.func @transform_2(%arg0: i32) -> (i32, i32) {
    %c0_i32 = arith.constant 0 : i32
    %c0_i32_0 = arith.constant 0 : i32
    %c0_i32_1 = arith.constant 0 : i32
    return %c0_i32, %c0_i32_0 : i32, i32
  }
  func.func @transform_3(%arg0: i32) -> (i32, i32) {
    %c0_i32 = arith.constant 0 : i32
    %c0_i32_0 = arith.constant 0 : i32
    %c0_i32_1 = arith.constant 0 : i32
    return %c0_i32, %c0_i32_0 : i32, i32
  }
  func.func @transform_4(%arg0: i32) -> (i32, i32) {
    %c0_i32 = arith.constant 0 : i32
    %c0_i32_0 = arith.constant 0 : i32
    %c0_i32_1 = arith.constant 0 : i32
    return %c0_i32, %c0_i32_0 : i32, i32
  }
  func.func @transform_5(%arg0: i32) -> (i32, i32) {
    %c0_i32 = arith.constant 0 : i32
    %c0_i32_0 = arith.constant 0 : i32
    return %c0_i32, %arg0 : i32, i32
  }
}

</mosaic_0001>

<bundles_post_ra>
// kernel: tpu_custom_call.1
= control target key start
LH: loop header
LB: loop body
LE: loop exit
PB: predicated region body
PF: predicated region fallthrough
CT: control target
= control target key end

     0   :  { %s444_s0 = inlined_call_operand.vmem [shape: f32[8,128], index: 0, kind: input, shape index: {}]   ;;  %s445_s1 = inlined_call_operand.vmem [shape: f32[32,8], index: 1, kind: input, shape index: {}]   ;;  %s446_s2 = inlined_call_operand.vmem [shape: f32[32,1], index: 2, kind: input, shape index: {}]   ;;  %s447_s3 = inlined_call_operand.vmem [shape: f32[1,32], index: 3, kind: input, shape index: {}]   ;;  %s448_s4 = inlined_call_operand.<no memory space> [shape: f32[1,1], index: 4, kind: input, shape index: {}]   ;;  %s449_s5 = inlined_call_operand.hbm [shape: f32[1,128], index: 5, kind: output, shape index: {}]  }
   0x1   :  { %v10_v0 = vstv %s448_s4 }
   0x2   :  { %11 = vst [vmem:[#allocation2] sm:$0x1] %v10_v0 }
   0x3   :  { %v23_v1 = vld [vmem:[%s444_s0] sm:$0xff]  ;;  %vm35_vm0 = vcmask 64512   ;;  %v32_v3 = vld [vmem:[%s445_s1 + $0x8] sm:$0xff]  ;;  %v33_v4 = vld [vmem:[%s445_s1 + $0x10] sm:$0xff]  ;;  %v360_v6 = vmov 0  }
   0x4   :  { %v31_v2 = vld [vmem:[%s445_s1] sm:$0xff]  ;;  %296 = vmatprep.subr.mxu0 %v23_v1  ;;  %326 = vset.pattern.permute.xlu0 %v360_v6  ;;  %v135_v7 = vld [vmem:[%s446_s2 + $0x10] sm:$0xff] }
   0x5   :  { %298 = vmatprep.mubr.msk.f32.mxu0 %vm35_vm0, %v31_v2  ;;  %v133_v5 = vld [vmem:[%s446_s2] sm:$0xff]  ;;  %297 = vmatpush3.msra.mxu0 %v23_v1 }
   0x6   :  { %299 = vmatmul.mubr.msk.f32.vlgmr.msra.gmra.mrb[0].mxu0 %vm35_vm0, %v32_v3  ;;  %139 = vperm.xlu0 %326, %v133_v5  }
   0x7   :  { %12 = vsyncpa [#allocation4], 0  ;;  %301 = vmatprep.mubr.msk.f32.mxu0 %vm35_vm0, %v33_v4  ;;  %v34_v8 = vld [vmem:[%s445_s1 + $0x18] sm:$0xff]  ;;  %v134_v9 = vld [vmem:[%s446_s2 + $0x8] sm:$0xff]  ;;  %327 = vset.pattern.permute.xlu1 %v360_v6  ;;  %v361_v12 = vmov 0.0|0.0   ;;  %vm362_vm1 = vmmov 0   ;;  %v24_v14 = vmul.f32 %v23_v1, %v23_v1  ;;  %v188_v56 = vlaneseq }
   0x8   :  { %149 = vperm.xlu1 %327, %v135_v7   ;;  %v136_v10 = vld [vmem:[%s446_s2 + $0x18] sm:$0xff]  ;;  %315 = vmatprep.subr.bf16.mxu1 %v361_v12  ;;  %v363_v13 = vmov 0.0   ;;  %v181_v55 = vld [vmem:[%s447_s3] sm:$0x1]  ;;  %vm192_vm2 = vcmask 261120   ;;  %s364_s11 = smov [#allocation3]  }
   0x9   :  { %v182_v11 = vld [vmem:[#allocation2] sm:$0x1]  ;;  %312 = vmatprep.mubr.msk.f32.mxu1 %vm362_vm1, %v363_v13  ;;  %v25_v15 = vrot.slane %v24_v14, 4  ;;  %v189_v57 = vshrl.u32 %v188_v56, 7  ;;  %s273_s12 = sshll.u32 %s364_s11, 4  ;;  %s274_s12 = int_to_ptr.vmem [resolvable:$true] %s273_s12 }
   0xa   :  { %302 = vmatmul.mubr.msk.f32.gmra.mrb[2].mxu0 %vm35_vm0, %v34_v8  ;;  %144 = vperm.xlu0 %326, %v134_v9   ;;  %s336_s13 = scalar_lea.vmem %s274_s12, 16  ;;  %s340_s14 = scalar_lea.vmem %s274_s12, 32 }
   0xb   :  { %v26_v16 = vadd.f32 %v25_v15, %v24_v14  ;;  %v190_v58 = vsub.s32 0, %v189_v57  ;;  %p337_p0 = scmp.ne.s32.totalorder %s274_s12, %s336_s13  ;;  %p341_p1 = scmp.lt.s32.totalorder %s274_s12, %s274_s12 }
   0xc   :  { %154 = vperm.xlu1 %327, %v136_v10   ;;  %p342_p2 = scmp.lt.s32.totalorder %s340_s14, %s336_s13 }
   0xd   :  { %v27_v17 = vrot.slane %v26_v16, 2 }
   0xe   :  { %185 = vperm.xlu0 %326, %v182_v11   ;;  %p343_p3 = por %p342_p2, %p341_p1 }
   0xf   :  { %v28_v18 = vadd.f32 %v27_v17, %v26_v16 }
  0x10   :  { %p344_p4 = pnand %p343_p3, %p337_p0 }
  0x11   :  { %v29_v19 = vrot.slane %v28_v18, 1 }
  0x13   :  { %v30_v22 = vadd.f32 %v29_v19, %v28_v18 }
  0x85   :  { %v140_v20 = vpop.permute.xlu0 %139 }
  0x86   :  { %v157_v25 = vadd.f32 %v140_v20, %v30_v22 }
  0x87   :  { %v150_v21 = vpop.permute.xlu1 %149 }
  0x88   :  { %v159_v33 = vadd.f32 %v150_v21, %v30_v22 }
  0x89   :  { %v145_v23 = vpop.permute.xlu0 %144 }
  0x8a   :  { %v158_v24 = vadd.f32 %v145_v23, %v30_v22 }
  0x8b   :  { %v155_v26 = vpop.permute.xlu1 %154 }
  0x8c   :  { %v160_v31 = vadd.f32 %v155_v26, %v30_v22 }
  0x8d   :  { %v186_v59 = vpop.permute.xlu0 %185 }
  0x8e   :  { %v191_v60 = vrot.slane %v186_v59, %v190_v58 }
  0xd9   :  { %v300_v27 = vpop.f32.mrb[0].mxu0 }
  0xda   :  { %v162_v28 = vadd.f32 %v300_v27, %v158_v24  ;;  %v114_v29 = vpop.f32.mrb[1].mxu0 }
  0xdb   :  { %v161_v30 = vadd.f32 %v157_v25, %v114_v29 }
  0xdc   :  { %v166_v32 = vmax.f32 %v162_v28, 0.0 }
  0xdd   :  { %v165_v34 = vmax.f32 %v161_v30, 0.0  ;;  %v303_v35 = vpop.f32.mrb[2].mxu0 }
  0xde   :  { %v170_v36 = vsub.f32 0.0, %v166_v32  ;;  %v164_v37 = vadd.f32 %v303_v35, %v160_v31  ;;  %v124_v38 = vpop.f32.mrb[3].mxu0 }
  0xdf   :  { %v169_v39 = vsub.f32 0.0, %v165_v34  ;;  %v163_v40 = vadd.f32 %v159_v33, %v124_v38 }
  0xe0   :  { %v175_v41 = vmul.f32 1.442695, %v170_v36  ;;  %v168_v42 = vmax.f32 %v164_v37, 0.0 }
  0xe1   :  { %v173_v43 = vmul.f32 1.442695, %v169_v39  ;;  %v167_v44 = vmax.f32 %v163_v40, 0.0 }
  0xe2   :  { %328 = vpow2.f32 %v175_v41  ;;  %v172_v45 = vsub.f32 0.0, %v168_v42 }
  0xe3   :  { %330 = vpow2.f32 %v173_v43  ;;  %v171_v46 = vsub.f32 0.0, %v167_v44 }
  0xe4   :  { %v179_v47 = vmul.f32 1.442695, %v172_v45 }
  0xe5   :  { %v177_v48 = vmul.f32 1.442695, %v171_v46 }
  0xe6   :  { %332 = vpow2.f32 %v179_v47 }
  0xe7   :  { %334 = vpow2.f32 %v177_v48 }
  0xec   :  { %v329_v49 = vpop.eup %328 }
  0xed   :  { %v331_v50 = vpop.eup %330 }
  0xee   :  { %v316_v51 = vpack.c.bf16 %v329_v49, %v331_v50 }
  0xf0   :  { %v333_v52 = vpop.eup %332  ;;  %317 = vmatpush3.bf16.msra.mxu1 %v316_v51 }
  0xf1   :  { %v335_v53 = vpop.eup %334  ;;  %318 = vmatprep.subr.bf16.mxu1 %v361_v12 }
  0xf2   :  { %v319_v54 = vpack.c.bf16 %v333_v52, %v335_v53 }
  0xf4   :  { %320 = vmatpush3.bf16.msra.mxu1 %v319_v54 }
  0xf7   :  { %313 = vmatmul.mubr.msk.f32.vlgmr.msra.gmra.mrb[0].mxu1 %vm192_vm2, %v181_v55 }
 0x1ca   :  { %v262_v61 = vpop.f32.mrb[0].mxu1 }
 0x1cb   :  { %v263_v62 = vadd.f32 %v262_v61, %v191_v60  ;;  %v314_v63 = vpop.f32.mrb[1].mxu1 }
 0x1cd   :  { %266 = vst [vmem:[#allocation3] sm:$0x1] %v263_v62 }
 0x1ce   :  { %347 = shalt.err (!%p344_p4)
}
 0x1cf   :  { %s348_s16 = scalar_lea.hbm %s449_s5, 16 }
 0x1d0   :  { %p349_p5 = scmp.ne.s32.totalorder %s449_s5, %s348_s16  ;;  %p352_p6 = scmp.lt.u32.totalorder %s348_s16, %s449_s5 }
 0x1d2   :  { %p354_p7 = pnand %p352_p6, %p349_p5 }
 0x1d4   :  { %357 = shalt.err (!%p354_p7)
}
 0x1d5   :  { %276 = dma.vmem_to_hbm [thread:$0]  %s274_s12, 16, %s449_s5, [#allocation4]  }
 0x1d6   :  { %358 = dma.done.wait [#allocation4], 16  }
 0x1d7   :  { %359 = vsyncadd [#allocation4], 4294967280 }
 0x1d8   :  { %280 = vsyncpa [#allocation4], 1 }

</bundles_post_ra>
